<compile_context>
chip_gen: v6e
topology: v6e:2x2x1
jax: 0.10.0
libtpu: 0.0.40
codegen_flags: <defaults>
</compile_context>

<pallas_src>
import jax
import jax.numpy as jnp
import numpy as np
from jax import lax
from jax.experimental import pallas as pl
from jax.experimental.pallas import tpu as pltpu


def _argmax_kernel(em_ref, idx_ref):
    """Per-timestep argmax over the label (sublane) axis.

    em_ref : (L, TILE_T) emission block in VMEM, native dtype, time on lanes.
    idx_ref: (1, TILE_T) int32 argmax indices (first maximal label, matching
             torch.argmax tie-breaking).
    """
    vals = em_ref[...].astype(jnp.float32)          # cast in-kernel (VPU slack)
    L = vals.shape[0]
    # NaN handling: torch.argmax treats NaN as the maximum (returns the first
    # NaN position).  Map NaN -> +inf so it wins the max and the min-index
    # tie-break picks the first one; also keeps the index in [0, L).
    vals = jnp.where(jnp.isnan(vals), jnp.float32(jnp.inf), vals)
    col_max = jnp.max(vals, axis=0, keepdims=True)            # (1, TILE_T)
    label_ids = lax.broadcasted_iota(jnp.int32, vals.shape, 0)
    cand = jnp.where(vals == col_max, label_ids, jnp.int32(L))
    idx_ref[...] = jnp.min(cand, axis=0, keepdims=True).astype(jnp.int32)


def _pick_tile_t(T: int, L: int, itemsize: int) -> int:
    """Time-tile size: multiple of 128 (or the full extent for tiny T)."""
    if T <= 128:
        return T  # block equals the full array dim -> always legal
    # Target ~4 MiB of emission per grid step (keeps v7x's ~3.2 TB/s HBM fed
    # past the ~0.35 us per-step overhead); two buffers stay well under even
    # v5e's scoped-VMEM default once we raise the limit below.
    target_cols = (4 * 1024 * 1024) // max(1, L * itemsize)
    tile = max(128, (target_cols // 128) * 128)
    # No point exceeding the 128-padded time extent.
    tile = min(tile, pl.cdiv(T, 128) * 128)
    return tile


def greedy_argmax(emission: jax.Array, *, tile_t: int | None = None) -> jax.Array:
    """Pallas wrapper: emission [T, L] -> argmax label indices [T] (int32)."""
    T, L = emission.shape
    # Time-on-lanes layout (layout plumbing recommended by the perf review).
    em_lt = jnp.transpose(emission)                 # (L, T), native dtype
    if tile_t is None:
        tile_t = _pick_tile_t(T, L, emission.dtype.itemsize)
    grid_t = pl.cdiv(T, tile_t)

    # TODO(synk): if L ever becomes a large vocab, add an "arbitrary" L grid
    # axis with running (max, argmax) accumulators in VMEM scratch.
    out = pl.pallas_call(
        _argmax_kernel,
        out_shape=jax.ShapeDtypeStruct((1, T), jnp.int32),
        grid=(grid_t,),
        in_specs=[pl.BlockSpec((L, tile_t), lambda i: (0, i))],
        out_specs=pl.BlockSpec((1, tile_t), lambda i: (0, i)),
        compiler_params=pltpu.CompilerParams(
            # Time tiles are independent -> shard across v7x's two TensorCores.
            dimension_semantics=("parallel",),
            # Explicit limit so double-buffered ~4 MiB tiles also fit v5e's
            # 16 MiB scoped default; 32 MiB is safe on v5e/v6e/v7x.
            vmem_limit_bytes=32 * 1024 * 1024,
        ),
    )(em_lt)
    return out[0, :]


def greedy_ctc_decode(emission: jax.Array, labels: str, blank: int = 0) -> str:
    """Full GreedyCTCDecoder.forward semantics (string join stays on host)."""
    indices = greedy_argmax(emission)                        # [T] int32, device
    # CTC collapse mask on device (vectorized trailing ops, no Python loop):
    # keep position t iff it differs from t-1 and is not the blank label.
    prev = jnp.concatenate(
        [jnp.full((1,), -1, dtype=jnp.int32), indices[:-1]])
    keep = jnp.logical_and(indices != prev, indices != jnp.int32(blank))
    idx_np, keep_np = jax.device_get((indices, keep))        # single transfer
    print(idx_np)                                            # mirrors torch's print(indices)
    kept = idx_np[keep_np]                                   # vectorized numpy
    return "".join(labels[int(i)] for i in kept)


def _reference_decode(emission_np: np.ndarray, labels: str, blank: int = 0) -> str:
    """Pure-numpy reference with torch semantics (for validation only)."""
    idx = np.argmax(emission_np, axis=-1)
    dedup = [idx[0]] + [idx[t] for t in range(1, idx.shape[0]) if idx[t] != idx[t - 1]]
    return "".join(labels[int(i)] for i in dedup if int(i) != blank)


if __name__ == "__main__":
    # Small shapes consistent with the module: num_seq=8, num_label=32.
    T, L = 8, 32
    labels = "-abcdefghijklmnopqrstuvwxyz '.,|"  # 32 labels, blank = index 0 ('-')
    assert len(labels) == L

    key = jax.random.PRNGKey(0)
    emission = jax.random.normal(key, (T, L), dtype=jnp.float32)

    # 1) Kernel argmax vs reference (f32, single full-extent tile).
    idx = greedy_argmax(emission)
    jax.block_until_ready(idx)
    ref = jnp.argmax(emission, axis=-1).astype(jnp.int32)
    assert bool(jnp.all(idx == ref)), "argmax kernel mismatch vs reference (f32)"

    # 2) Native-dtype (bf16) input, multi-tile grid with a partial last tile.
    T2 = 300
    em_bf16 = jax.random.normal(jax.random.PRNGKey(1), (T2, L)).astype(jnp.bfloat16)
    idx2 = greedy_argmax(em_bf16, tile_t=128)                # grid of 3 tiles
    jax.block_until_ready(idx2)
    ref2 = jnp.argmax(em_bf16.astype(jnp.float32), axis=-1).astype(jnp.int32)
    assert bool(jnp.all(idx2 == ref2)), "argmax kernel mismatch vs reference (bf16 tiled)"

    # 3) NaN edge case: first NaN position wins (torch.argmax semantics).
    em_nan = emission.at[2, 5].set(jnp.nan)
    idx3 = greedy_argmax(em_nan)
    jax.block_until_ready(idx3)
    assert int(idx3[2]) == 5, "NaN handling mismatch"

    # 4) Full forward (argmax kernel + on-device collapse mask + host join).
    transcript = greedy_ctc_decode(emission, labels, blank=0)
    ref_transcript = _reference_decode(np.asarray(jax.device_get(emission)), labels, 0)
    assert transcript == ref_transcript, "decode mismatch vs reference"

    print("KERNEL_OK")
</pallas_src>

<mosaic_0001>
module attributes {stable_mosaic.version = 11 : i64} {
  func.func @_argmax_kernel(%arg0: i32, %arg1: memref<32x8xf32, #tpu.memory_space<vmem>>, %arg2: memref<1x8xi32, #tpu.memory_space<vmem>>) attributes {dimension_semantics = [#tpu.dimension_semantics<parallel>], iteration_bounds = array<i64: 1>, scalar_prefetch = 0 : i64, scratch_operands = 0 : i64, tpu.core_type = #tpu.core_type<tc>, window_params = [{transform_indices = @transform_0, window_bounds = array<i64: 32, 8>}, {transform_indices = @transform_1, window_bounds = array<i64: 1, 8>}]} {
    %c0 = arith.constant 0 : index
    %c0_0 = arith.constant 0 : index
    %0 = vector.load %arg1[%c0, %c0_0] : memref<32x8xf32, #tpu.memory_space<vmem>>, vector<32x8xf32>
    %1 = arith.cmpf one, %0, %0 : vector<32x8xf32>
    %cst = arith.constant 0x7F800000 : f32
    %2 = vector.broadcast %cst : f32 to vector<32x8xf32>
    %3 = arith.select %1, %2, %0 : vector<32x8xi1>, vector<32x8xf32>
    %cst_1 = arith.constant dense<0xFF800000> : vector<8xf32>
    %4 = vector.multi_reduction <maximumf>, %3, %cst_1 [0] : vector<32x8xf32> to vector<8xf32>
    %5 = vector.shape_cast %4 : vector<8xf32> to vector<1x8xf32>
    %6 = tpu.iota {dimensions = array<i32: 0>} : vector<32x8xi32>
    %7 = vector.broadcast %5 : vector<1x8xf32> to vector<32x8xf32>
    %8 = arith.cmpf oeq, %3, %7 : vector<32x8xf32>
    %c32_i32 = arith.constant 32 : i32
    %9 = vector.broadcast %c32_i32 : i32 to vector<32x8xi32>
    %10 = arith.select %8, %6, %9 : vector<32x8xi1>, vector<32x8xi32>
    %cst_2 = arith.constant dense<2147483647> : vector<8xi32>
    %11 = vector.multi_reduction <minsi>, %10, %cst_2 [0] : vector<32x8xi32> to vector<8xi32>
    %12 = vector.shape_cast %11 : vector<8xi32> to vector<1x8xi32>
    %c0_3 = arith.constant 0 : index
    %c0_4 = arith.constant 0 : index
    %13 = vector.load %arg2[%c0_3, %c0_4] : memref<1x8xi32, #tpu.memory_space<vmem>>, vector<1x8xi32>
    tpu.vector_store %arg2[%c0_3, %c0_4], %12 {strides = array<i32>} : memref<1x8xi32, #tpu.memory_space<vmem>>, vector<1x8xi32>,
    return
  }
  func.func @transform_0(%arg0: i32) -> (i32, i32) {
    %c0_i32 = arith.constant 0 : i32
    %c0_i32_0 = arith.constant 0 : i32
    return %c0_i32, %arg0 : i32, i32
  }
  func.func @transform_1(%arg0: i32) -> (i32, i32) {
    %c0_i32 = arith.constant 0 : i32
    %c0_i32_0 = arith.constant 0 : i32
    return %c0_i32, %arg0 : i32, i32
  }
}

</mosaic_0001>

<bundles_post_ra>
// kernel: tpu_custom_call.1
= control target key start
LH: loop header
LB: loop body
LE: loop exit
PB: predicated region body
PF: predicated region fallthrough
CT: control target
= control target key end

     0   :  { %vm21_vm0 = vcmask 64512   ;;  %s140_s0 = inlined_call_operand.vmem [shape: f32[32,8], index: 0, kind: input, shape index: {}]   ;;  %s141_s1 = inlined_call_operand.hbm [shape: s32[1,8], index: 1, kind: output, shape index: {}]  }
   0x1   :  { %v9_v0 = vld [vmem:[%s140_s0] sm:$0xff]  ;;  %v10_v1 = vld [vmem:[%s140_s0 + $0x8] sm:$0xff]  ;;  %v11_v2 = vld [vmem:[%s140_s0 + $0x10] sm:$0xff] }
   0x2   :  { %v12_v3 = vld [vmem:[%s140_s0 + $0x18] sm:$0xff]  ;;  %vm13_vm1 = vcmp.ne.f32.partialorder %v9_v0, %v9_v0  ;;  %vm14_vm2 = vcmp.ne.f32.partialorder %v10_v1, %v10_v1  ;;  %vm15_vm3 = vcmp.ne.f32.partialorder %v11_v2, %v11_v2 }
   0x3   :  { %6 = vsyncpa [#allocation3], 0  ;;  %vm16_vm4 = vcmp.ne.f32.partialorder %v12_v3, %v12_v3  ;;  %v17_v4 = vsel %vm13_vm1, inf, %v9_v0  ;;  %v18_v5 = vsel %vm14_vm2, inf, %v10_v1  ;;  %v19_v6 = vsel %vm15_vm3, inf, %v11_v2  ;;  %s106_s0 = smov [#allocation2]  }
   0x4   :  { %v20_v7 = vsel %vm16_vm4, inf, %v12_v3  ;;  %v22_v8 = vsel %vm21_vm0, %v17_v4, -inf  ;;  %v23_v9 = vsel %vm21_vm0, %v18_v5, -inf  ;;  %v24_v10 = vsel %vm21_vm0, %v19_v6, -inf  ;;  %s75_s14 = sshll.u32 %s106_s0, 4  ;;  %s76_s14 = int_to_ptr.vmem [resolvable:$true] %s75_s14 }
   0x5   :  { %v25_v11 = vsel %vm21_vm0, %v20_v7, -inf  ;;  %v26_v12 = vmax.f32 %v22_v8, %v23_v9  ;;  %v35_v16 = vlaneseq  ;;  %vm67_vm14 = vcmask 57344   ;;  %s84_s15 = scalar_lea.vmem %s76_s14, 16  ;;  %s88_s16 = scalar_lea.vmem %s76_s14, 32 }
   0x6   :  { %v27_v13 = vmax.f32 %v24_v10, %v25_v11  ;;  %p85_p0 = scmp.ne.s32.totalorder %s76_s14, %s84_s15  ;;  %p89_p1 = scmp.lt.s32.totalorder %s76_s14, %s76_s14 }
   0x7   :  { %v36_v19 = vshrl.u32 %v35_v16, 7  ;;  %p90_p2 = scmp.lt.s32.totalorder %s88_s16, %s84_s15 }
   0x8   :  { %v28_v14 = vmax.f32 %v26_v12, %v27_v13 }
   0x9   :  { %v37_v22 = vadd.s32 8, %v36_v19  ;;  %v38_v23 = vadd.s32 16, %v36_v19  ;;  %v39_v24 = vadd.s32 24, %v36_v19  ;;  %p91_p3 = por %p90_p2, %p89_p1 }
   0xa   :  { %v29_v15 = vrot.slane %v28_v14, 4 }
   0xb   :  { %p92_p4 = pnand %p91_p3, %p85_p0 }
   0xc   :  { %v30_v17 = vmax.f32 %v28_v14, %v29_v15 }
   0xe   :  { %v31_v18 = vrot.slane %v30_v17, 2 }
  0x10   :  { %v32_v20 = vmax.f32 %v30_v17, %v31_v18 }
  0x12   :  { %v33_v21 = vrot.slane %v32_v20, 1 }
  0x14   :  { %v34_v25 = vmax.f32 %v32_v20, %v33_v21 }
  0x16   :  { %vm40_vm5 = vcmp.eq.f32.partialorder %v17_v4, %v34_v25  ;;  %vm41_vm6 = vcmp.eq.f32.partialorder %v18_v5, %v34_v25  ;;  %vm42_vm7 = vcmp.eq.f32.partialorder %v19_v6, %v34_v25  ;;  %vm43_vm8 = vcmp.eq.f32.partialorder %v20_v7, %v34_v25 }
  0x17   :  { %v44_v26 = vsel %vm40_vm5, %v36_v19, 32  ;;  %v45_v27 = vsel %vm41_vm6, %v37_v22, 32  ;;  %v46_v28 = vsel %vm42_vm7, %v38_v23, 32  ;;  %v47_v29 = vsel %vm43_vm8, %v39_v24, 32 }
  0x18   :  { %v48_v30 = vsel %vm21_vm0, %v44_v26, 2147483647  ;;  %v49_v31 = vsel %vm21_vm0, %v45_v27, 2147483647  ;;  %v50_v32 = vsel %vm21_vm0, %v46_v28, 2147483647 }
  0x19   :  { %v51_v33 = vsel %vm21_vm0, %v47_v29, 2147483647  ;;  %vm52_vm9 = vcmp.lt.s32.totalorder %v48_v30, %v49_v31 }
  0x1a   :  { %v53_v34 = vsel %vm52_vm9, %v48_v30, %v49_v31  ;;  %vm54_vm10 = vcmp.lt.s32.totalorder %v50_v32, %v51_v33 }
  0x1b   :  { %v55_v35 = vsel %vm54_vm10, %v50_v32, %v51_v33 }
  0x1c   :  { %vm56_vm11 = vcmp.lt.s32.totalorder %v53_v34, %v55_v35 }
  0x1d   :  { %v57_v36 = vsel %vm56_vm11, %v53_v34, %v55_v35 }
  0x1e   :  { %v58_v37 = vrot.slane %v57_v36, 4 }
  0x20   :  { %vm59_vm12 = vcmp.lt.s32.totalorder %v57_v36, %v58_v37 }
  0x21   :  { %v60_v38 = vsel %vm59_vm12, %v57_v36, %v58_v37 }
  0x22   :  { %v61_v39 = vrot.slane %v60_v38, 2 }
  0x24   :  { %vm62_vm13 = vcmp.lt.s32.totalorder %v60_v38, %v61_v39 }
  0x25   :  { %v63_v40 = vsel %vm62_vm13, %v60_v38, %v61_v39 }
  0x26   :  { %v64_v41 = vrot.slane %v63_v40, 1 }
  0x28   :  { %vm65_vm15 = vcmp.lt.s32.totalorder %v63_v40, %v64_v41 }
  0x29   :  { %v66_v42 = vsel %vm65_vm15, %v63_v40, %v64_v41 }
  0x2a   :  { %68 = vst.msk [vmem:[#allocation2] sm:$0x1] %vm67_vm14, %v66_v42 }
  0x2b   :  { %95 = shalt.err (!%p92_p4)
}
  0x2c   :  { %78 = dma.vmem_to_hbm [thread:$0]  %s76_s14, 16, %s141_s1, [#allocation3]  }
  0x2d   :  { %104 = dma.done.wait [#allocation3], 16  }
  0x2e   :  { %105 = vsyncadd [#allocation3], 4294967280 }
  0x2f   :  { %82 = vsyncpa [#allocation3], 1 }

</bundles_post_ra>
